<compile_context>
chip_gen: v7x
topology: tpu7x:2x2x1
jax: 0.10.0
libtpu: 0.0.40
codegen_flags: <defaults>
</compile_context>

<pallas_src>
import jax
import jax.numpy as jnp
from jax.experimental import pallas as pl
from jax.experimental.pallas import tpu as pltpu

# Conv hyper-params (match the PyTorch module)
C_IN, C_OUT, KH, KW = 3, 1, 3, 3
STRIDE, PAD = 2, 1
K = C_IN * KH * KW                      # 27 taps

# VMEM budget for ONE input block (Pallas double-buffers it).
_VMEM_PER_BUF = 6 * 1024 * 1024


def _conv_hardswish_kernel(xp_ref, w_ref, b_ref, o_ref):
    """Fused stride-2 3x3 conv (C_out=1) + hardswish epilogue.

    xp_ref: (NB, 2, 2, C_IN, OH+1, OW+1) VMEM -- stride-2 parity planes,
            xp_ref[n, pr, pc, c, i, j] == x_padded[n, c, 2*i+pr, 2*j+pc]
    w_ref : (K,) SMEM  -- conv weights, flat  c*9 + kh*3 + kw  order
    b_ref : (1,) SMEM  -- bias scalar
    o_ref : (NB, OH, OW) VMEM
    """
    nb, oh, ow = o_ref.shape
    acc = jnp.zeros((nb, oh, ow), jnp.float32)
    for c in range(C_IN):
        for pr in range(2):
            for pc in range(2):
                # Load each parity plane once; taps sharing it are slices.
                plane = xp_ref[:, pr, pc, c]            # (nb, oh+1, ow+1)
                for kh in range(pr, KH, 2):
                    for kw in range(pc, KW, 2):
                        w = w_ref[c * KH * KW + kh * KW + kw]   # SMEM scalar
                        tap = plane[:, kh // 2: kh // 2 + oh,
                                       kw // 2: kw // 2 + ow]   # (nb, oh, ow)
                        acc = acc + w * tap
    t1 = acc + b_ref[0]
    t3 = jnp.clip(t1 + 3.0, 0.0, 6.0)
    o_ref[...] = (t1 * t3 * (1.0 / 6.0)).astype(o_ref.dtype)


def model_forward(x, weight, bias):
    """x: (N, 3, H, W); weight: (1, 3, 3, 3); bias: (1,). Returns (N, 1, OH, OW)."""
    x = x.astype(jnp.float32)
    N, C, H, W = x.shape
    assert C == C_IN
    OH = (H + 2 * PAD - KH) // STRIDE + 1
    OW = (W + 2 * PAD - KW) // STRIDE + 1
    OH1, OW1 = OH + 1, OW + 1
    HP, WP = STRIDE * OH1, STRIDE * OW1          # even padded spatial extents

    # Single fused XLA pass: zero-pad + stride-2 pixel-unshuffle into parity
    # planes.  planes[n, pr, pc, c, i, j] == x_padded[n, c, 2*i+pr, 2*j+pc].
    xp = jnp.pad(x, ((0, 0), (0, 0), (PAD, HP - H - PAD), (PAD, WP - W - PAD)))
    planes = xp.reshape(N, C_IN, OH1, 2, OW1, 2).transpose(0, 3, 5, 1, 2, 4)

    # Batch tiling: respect the VMEM budget (accounting for (8,128) tile
    # padding of the (OH1, OW1) minor dims) and ensure >= 2 grid steps when
    # N >= 2 so both v7x TensorCores get work.
    vmem_per_img = (4 * C_IN
                    * (pl.cdiv(OH1, 8) * 8)
                    * (pl.cdiv(OW1, 128) * 128) * 4)
    nb = max(1, min(N, _VMEM_PER_BUF // vmem_per_img))
    if N >= 2:
        nb = min(nb, pl.cdiv(N, 2))
    nsteps = pl.cdiv(N, nb)
    n_pad = nsteps * nb
    if n_pad != N:
        planes = jnp.pad(planes, ((0, n_pad - N),) + ((0, 0),) * 5)

    w_flat = weight.reshape(K).astype(jnp.float32)     # c*9 + kh*3 + kw order
    b_flat = bias.reshape(1).astype(jnp.float32)

    out = pl.pallas_call(
        _conv_hardswish_kernel,
        out_shape=jax.ShapeDtypeStruct((n_pad, OH, OW), jnp.float32),
        grid_spec=pltpu.PrefetchScalarGridSpec(
            num_scalar_prefetch=0,
            grid=(nsteps,),
            in_specs=[
                pl.BlockSpec((nb, 2, 2, C_IN, OH1, OW1),
                             lambda i: (i, 0, 0, 0, 0, 0)),          # planes
                pl.BlockSpec(memory_space=pltpu.MemorySpace.SMEM),   # weights
                pl.BlockSpec(memory_space=pltpu.MemorySpace.SMEM),   # bias
            ],
            out_specs=pl.BlockSpec((nb, OH, OW), lambda i: (i, 0, 0)),
        ),
        compiler_params=pltpu.CompilerParams(
            dimension_semantics=("parallel",),
            vmem_limit_bytes=32 * 1024 * 1024,
        ),
    )(planes, w_flat, b_flat)

    return out[:N].reshape(N, C_OUT, OH, OW)


def _reference(x, weight, bias):
    """Pure-JAX reference using lax conv (correctness check)."""
    t1 = jax.lax.conv_general_dilated(
        x.astype(jnp.float32), weight.astype(jnp.float32),
        window_strides=(STRIDE, STRIDE),
        padding=((PAD, PAD), (PAD, PAD)),
        dimension_numbers=("NCHW", "OIHW", "NCHW"),
    ) + bias.reshape(1, C_OUT, 1, 1)
    t3 = jnp.clip(t1 + 3.0, 0.0, 6.0)
    return t1 * t3 / 6.0


if __name__ == "__main__":
    key = jax.random.PRNGKey(0)
    kx, kw_key, kb_key = jax.random.split(key, 3)

    # Small shapes consistent with the module: batch=2, 3 in-channels, 16x16.
    N, H, W = 2, 16, 16
    x = jax.random.normal(kx, (N, C_IN, H, W), dtype=jnp.float32)

    # Deterministic synthetic Conv2d(3, 1, 3) parameters.
    fan_in = C_IN * KH * KW
    bound = 1.0 / (fan_in ** 0.5)
    weight = jax.random.uniform(kw_key, (C_OUT, C_IN, KH, KW),
                                minval=-bound, maxval=bound, dtype=jnp.float32)
    bias = jax.random.uniform(kb_key, (C_OUT,),
                              minval=-bound, maxval=bound, dtype=jnp.float32)

    out = model_forward(x, weight, bias)
    out = jax.block_until_ready(out)

    ref = _reference(x, weight, bias)
    assert out.shape == ref.shape == (N, C_OUT, 8, 8)
    assert jnp.allclose(out, ref, atol=1e-5, rtol=1e-4)

    print("KERNEL_OK")
</pallas_src>

<mosaic_0001>
module attributes {stable_mosaic.version = 11 : i64} {
  func.func @_conv_hardswish_kernel(%arg0: i32, %arg1: memref<1x2x2x3x9x9xf32, #tpu.memory_space<vmem>>, %arg2: memref<27xf32, #tpu.memory_space<smem>>, %arg3: memref<1xf32, #tpu.memory_space<smem>>, %arg4: memref<1x8x8xf32, #tpu.memory_space<vmem>>) attributes {dimension_semantics = [#tpu.dimension_semantics<parallel>], iteration_bounds = array<i64: 2>, scalar_prefetch = 0 : i64, scratch_operands = 0 : i64, tpu.core_type = #tpu.core_type<tc>, window_params = [{transform_indices = @transform_0, window_bounds = array<i64: 1, 2, 2, 3, 9, 9>}, {transform_indices = @transform_1, window_bounds = array<i64: 27>}, {transform_indices = @transform_2, window_bounds = array<i64: 1>}, {transform_indices = @transform_3, window_bounds = array<i64: 1, 8, 8>}]} {
    %cst = arith.constant 0.000000e+00 : f32
    %0 = vector.broadcast %cst : f32 to vector<1x8x8xf32>
    %c0 = arith.constant 0 : index
    %c0_0 = arith.constant 0 : index
    %c0_1 = arith.constant 0 : index
    %c0_2 = arith.constant 0 : index
    %c0_3 = arith.constant 0 : index
    %c0_4 = arith.constant 0 : index
    %1 = vector.load %arg1[%c0, %c0_0, %c0_1, %c0_2, %c0_3, %c0_4] : memref<1x2x2x3x9x9xf32, #tpu.memory_space<vmem>>, vector<1x1x1x1x9x9xf32>
    %2 = vector.shape_cast %1 : vector<1x1x1x1x9x9xf32> to vector<1x9x9xf32>
    %c0_5 = arith.constant 0 : index
    %3 = memref.load %arg2[%c0_5] : memref<27xf32, #tpu.memory_space<smem>>
    %4 = vector.extract_strided_slice %2 {offsets = [0, 0, 0], sizes = [1, 8, 8], strides = [1, 1, 1]} : vector<1x9x9xf32> to vector<1x8x8xf32>
    %5 = vector.broadcast %3 : f32 to vector<1x8x8xf32>
    %6 = arith.mulf %5, %4 : vector<1x8x8xf32>
    %7 = arith.addf %0, %6 : vector<1x8x8xf32>
    %c2 = arith.constant 2 : index
    %8 = memref.load %arg2[%c2] : memref<27xf32, #tpu.memory_space<smem>>
    %9 = vector.extract_strided_slice %2 {offsets = [0, 0, 1], sizes = [1, 8, 8], strides = [1, 1, 1]} : vector<1x9x9xf32> to vector<1x8x8xf32>
    %10 = vector.broadcast %8 : f32 to vector<1x8x8xf32>
    %11 = arith.mulf %10, %9 : vector<1x8x8xf32>
    %12 = arith.addf %7, %11 : vector<1x8x8xf32>
    %c6 = arith.constant 6 : index
    %13 = memref.load %arg2[%c6] : memref<27xf32, #tpu.memory_space<smem>>
    %14 = vector.extract_strided_slice %2 {offsets = [0, 1, 0], sizes = [1, 8, 8], strides = [1, 1, 1]} : vector<1x9x9xf32> to vector<1x8x8xf32>
    %15 = vector.broadcast %13 : f32 to vector<1x8x8xf32>
    %16 = arith.mulf %15, %14 : vector<1x8x8xf32>
    %17 = arith.addf %12, %16 : vector<1x8x8xf32>
    %c8 = arith.constant 8 : index
    %18 = memref.load %arg2[%c8] : memref<27xf32, #tpu.memory_space<smem>>
    %19 = vector.extract_strided_slice %2 {offsets = [0, 1, 1], sizes = [1, 8, 8], strides = [1, 1, 1]} : vector<1x9x9xf32> to vector<1x8x8xf32>
    %20 = vector.broadcast %18 : f32 to vector<1x8x8xf32>
    %21 = arith.mulf %20, %19 : vector<1x8x8xf32>
    %22 = arith.addf %17, %21 : vector<1x8x8xf32>
    %c0_6 = arith.constant 0 : index
    %c0_7 = arith.constant 0 : index
    %c1 = arith.constant 1 : index
    %c0_8 = arith.constant 0 : index
    %c0_9 = arith.constant 0 : index
    %c0_10 = arith.constant 0 : index
    %23 = vector.load %arg1[%c0_6, %c0_7, %c1, %c0_8, %c0_9, %c0_10] : memref<1x2x2x3x9x9xf32, #tpu.memory_space<vmem>>, vector<1x1x1x1x9x9xf32>
    %24 = vector.shape_cast %23 : vector<1x1x1x1x9x9xf32> to vector<1x9x9xf32>
    %c1_11 = arith.constant 1 : index
    %25 = memref.load %arg2[%c1_11] : memref<27xf32, #tpu.memory_space<smem>>
    %26 = vector.extract_strided_slice %24 {offsets = [0, 0, 0], sizes = [1, 8, 8], strides = [1, 1, 1]} : vector<1x9x9xf32> to vector<1x8x8xf32>
    %27 = vector.broadcast %25 : f32 to vector<1x8x8xf32>
    %28 = arith.mulf %27, %26 : vector<1x8x8xf32>
    %29 = arith.addf %22, %28 : vector<1x8x8xf32>
    %c7 = arith.constant 7 : index
    %30 = memref.load %arg2[%c7] : memref<27xf32, #tpu.memory_space<smem>>
    %31 = vector.extract_strided_slice %24 {offsets = [0, 1, 0], sizes = [1, 8, 8], strides = [1, 1, 1]} : vector<1x9x9xf32> to vector<1x8x8xf32>
    %32 = vector.broadcast %30 : f32 to vector<1x8x8xf32>
    %33 = arith.mulf %32, %31 : vector<1x8x8xf32>
    %34 = arith.addf %29, %33 : vector<1x8x8xf32>
    %c0_12 = arith.constant 0 : index
    %c1_13 = arith.constant 1 : index
    %c0_14 = arith.constant 0 : index
    %c0_15 = arith.constant 0 : index
    %c0_16 = arith.constant 0 : index
    %c0_17 = arith.constant 0 : index
    %35 = vector.load %arg1[%c0_12, %c1_13, %c0_14, %c0_15, %c0_16, %c0_17] : memref<1x2x2x3x9x9xf32, #tpu.memory_space<vmem>>, vector<1x1x1x1x9x9xf32>
    %36 = vector.shape_cast %35 : vector<1x1x1x1x9x9xf32> to vector<1x9x9xf32>
    %c3 = arith.constant 3 : index
    %37 = memref.load %arg2[%c3] : memref<27xf32, #tpu.memory_space<smem>>
    %38 = vector.extract_strided_slice %36 {offsets = [0, 0, 0], sizes = [1, 8, 8], strides = [1, 1, 1]} : vector<1x9x9xf32> to vector<1x8x8xf32>
    %39 = vector.broadcast %37 : f32 to vector<1x8x8xf32>
    %40 = arith.mulf %39, %38 : vector<1x8x8xf32>
    %41 = arith.addf %34, %40 : vector<1x8x8xf32>
    %c5 = arith.constant 5 : index
    %42 = memref.load %arg2[%c5] : memref<27xf32, #tpu.memory_space<smem>>
    %43 = vector.extract_strided_slice %36 {offsets = [0, 0, 1], sizes = [1, 8, 8], strides = [1, 1, 1]} : vector<1x9x9xf32> to vector<1x8x8xf32>
    %44 = vector.broadcast %42 : f32 to vector<1x8x8xf32>
    %45 = arith.mulf %44, %43 : vector<1x8x8xf32>
    %46 = arith.addf %41, %45 : vector<1x8x8xf32>
    %c0_18 = arith.constant 0 : index
    %c1_19 = arith.constant 1 : index
    %c1_20 = arith.constant 1 : index
    %c0_21 = arith.constant 0 : index
    %c0_22 = arith.constant 0 : index
    %c0_23 = arith.constant 0 : index
    %47 = vector.load %arg1[%c0_18, %c1_19, %c1_20, %c0_21, %c0_22, %c0_23] : memref<1x2x2x3x9x9xf32, #tpu.memory_space<vmem>>, vector<1x1x1x1x9x9xf32>
    %48 = vector.shape_cast %47 : vector<1x1x1x1x9x9xf32> to vector<1x9x9xf32>
    %c4 = arith.constant 4 : index
    %49 = memref.load %arg2[%c4] : memref<27xf32, #tpu.memory_space<smem>>
    %50 = vector.extract_strided_slice %48 {offsets = [0, 0, 0], sizes = [1, 8, 8], strides = [1, 1, 1]} : vector<1x9x9xf32> to vector<1x8x8xf32>
    %51 = vector.broadcast %49 : f32 to vector<1x8x8xf32>
    %52 = arith.mulf %51, %50 : vector<1x8x8xf32>
    %53 = arith.addf %46, %52 : vector<1x8x8xf32>
    %c0_24 = arith.constant 0 : index
    %c0_25 = arith.constant 0 : index
    %c0_26 = arith.constant 0 : index
    %c1_27 = arith.constant 1 : index
    %c0_28 = arith.constant 0 : index
    %c0_29 = arith.constant 0 : index
    %54 = vector.load %arg1[%c0_24, %c0_25, %c0_26, %c1_27, %c0_28, %c0_29] : memref<1x2x2x3x9x9xf32, #tpu.memory_space<vmem>>, vector<1x1x1x1x9x9xf32>
    %55 = vector.shape_cast %54 : vector<1x1x1x1x9x9xf32> to vector<1x9x9xf32>
    %c9 = arith.constant 9 : index
    %56 = memref.load %arg2[%c9] : memref<27xf32, #tpu.memory_space<smem>>
    %57 = vector.extract_strided_slice %55 {offsets = [0, 0, 0], sizes = [1, 8, 8], strides = [1, 1, 1]} : vector<1x9x9xf32> to vector<1x8x8xf32>
    %58 = vector.broadcast %56 : f32 to vector<1x8x8xf32>
    %59 = arith.mulf %58, %57 : vector<1x8x8xf32>
    %60 = arith.addf %53, %59 : vector<1x8x8xf32>
    %c11 = arith.constant 11 : index
    %61 = memref.load %arg2[%c11] : memref<27xf32, #tpu.memory_space<smem>>
    %62 = vector.extract_strided_slice %55 {offsets = [0, 0, 1], sizes = [1, 8, 8], strides = [1, 1, 1]} : vector<1x9x9xf32> to vector<1x8x8xf32>
    %63 = vector.broadcast %61 : f32 to vector<1x8x8xf32>
    %64 = arith.mulf %63, %62 : vector<1x8x8xf32>
    %65 = arith.addf %60, %64 : vector<1x8x8xf32>
    %c15 = arith.constant 15 : index
    %66 = memref.load %arg2[%c15] : memref<27xf32, #tpu.memory_space<smem>>
    %67 = vector.extract_strided_slice %55 {offsets = [0, 1, 0], sizes = [1, 8, 8], strides = [1, 1, 1]} : vector<1x9x9xf32> to vector<1x8x8xf32>
    %68 = vector.broadcast %66 : f32 to vector<1x8x8xf32>
    %69 = arith.mulf %68, %67 : vector<1x8x8xf32>
    %70 = arith.addf %65, %69 : vector<1x8x8xf32>
    %c17 = arith.constant 17 : index
    %71 = memref.load %arg2[%c17] : memref<27xf32, #tpu.memory_space<smem>>
    %72 = vector.extract_strided_slice %55 {offsets = [0, 1, 1], sizes = [1, 8, 8], strides = [1, 1, 1]} : vector<1x9x9xf32> to vector<1x8x8xf32>
    %73 = vector.broadcast %71 : f32 to vector<1x8x8xf32>
    %74 = arith.mulf %73, %72 : vector<1x8x8xf32>
    %75 = arith.addf %70, %74 : vector<1x8x8xf32>
    %c0_30 = arith.constant 0 : index
    %c0_31 = arith.constant 0 : index
    %c1_32 = arith.constant 1 : index
    %c1_33 = arith.constant 1 : index
    %c0_34 = arith.constant 0 : index
    %c0_35 = arith.constant 0 : index
    %76 = vector.load %arg1[%c0_30, %c0_31, %c1_32, %c1_33, %c0_34, %c0_35] : memref<1x2x2x3x9x9xf32, #tpu.memory_space<vmem>>, vector<1x1x1x1x9x9xf32>
    %77 = vector.shape_cast %76 : vector<1x1x1x1x9x9xf32> to vector<1x9x9xf32>
    %c10 = arith.constant 10 : index
    %78 = memref.load %arg2[%c10] : memref<27xf32, #tpu.memory_space<smem>>
    %79 = vector.extract_strided_slice %77 {offsets = [0, 0, 0], sizes = [1, 8, 8], strides = [1, 1, 1]} : vector<1x9x9xf32> to vector<1x8x8xf32>
    %80 = vector.broadcast %78 : f32 to vector<1x8x8xf32>
    %81 = arith.mulf %80, %79 : vector<1x8x8xf32>
    %82 = arith.addf %75, %81 : vector<1x8x8xf32>
    %c16 = arith.constant 16 : index
    %83 = memref.load %arg2[%c16] : memref<27xf32, #tpu.memory_space<smem>>
    %84 = vector.extract_strided_slice %77 {offsets = [0, 1, 0], sizes = [1, 8, 8], strides = [1, 1, 1]} : vector<1x9x9xf32> to vector<1x8x8xf32>
    %85 = vector.broadcast %83 : f32 to vector<1x8x8xf32>
    %86 = arith.mulf %85, %84 : vector<1x8x8xf32>
    %87 = arith.addf %82, %86 : vector<1x8x8xf32>
    %c0_36 = arith.constant 0 : index
    %c1_37 = arith.constant 1 : index
    %c0_38 = arith.constant 0 : index
    %c1_39 = arith.constant 1 : index
    %c0_40 = arith.constant 0 : index
    %c0_41 = arith.constant 0 : index
    %88 = vector.load %arg1[%c0_36, %c1_37, %c0_38, %c1_39, %c0_40, %c0_41] : memref<1x2x2x3x9x9xf32, #tpu.memory_space<vmem>>, vector<1x1x1x1x9x9xf32>
    %89 = vector.shape_cast %88 : vector<1x1x1x1x9x9xf32> to vector<1x9x9xf32>
    %c12 = arith.constant 12 : index
    %90 = memref.load %arg2[%c12] : memref<27xf32, #tpu.memory_space<smem>>
    %91 = vector.extract_strided_slice %89 {offsets = [0, 0, 0], sizes = [1, 8, 8], strides = [1, 1, 1]} : vector<1x9x9xf32> to vector<1x8x8xf32>
    %92 = vector.broadcast %90 : f32 to vector<1x8x8xf32>
    %93 = arith.mulf %92, %91 : vector<1x8x8xf32>
    %94 = arith.addf %87, %93 : vector<1x8x8xf32>
    %c14 = arith.constant 14 : index
    %95 = memref.load %arg2[%c14] : memref<27xf32, #tpu.memory_space<smem>>
    %96 = vector.extract_strided_slice %89 {offsets = [0, 0, 1], sizes = [1, 8, 8], strides = [1, 1, 1]} : vector<1x9x9xf32> to vector<1x8x8xf32>
    %97 = vector.broadcast %95 : f32 to vector<1x8x8xf32>
    %98 = arith.mulf %97, %96 : vector<1x8x8xf32>
    %99 = arith.addf %94, %98 : vector<1x8x8xf32>
    %c0_42 = arith.constant 0 : index
    %c1_43 = arith.constant 1 : index
    %c1_44 = arith.constant 1 : index
    %c1_45 = arith.constant 1 : index
    %c0_46 = arith.constant 0 : index
    %c0_47 = arith.constant 0 : index
    %100 = vector.load %arg1[%c0_42, %c1_43, %c1_44, %c1_45, %c0_46, %c0_47] : memref<1x2x2x3x9x9xf32, #tpu.memory_space<vmem>>, vector<1x1x1x1x9x9xf32>
    %101 = vector.shape_cast %100 : vector<1x1x1x1x9x9xf32> to vector<1x9x9xf32>
    %c13 = arith.constant 13 : index
    %102 = memref.load %arg2[%c13] : memref<27xf32, #tpu.memory_space<smem>>
    %103 = vector.extract_strided_slice %101 {offsets = [0, 0, 0], sizes = [1, 8, 8], strides = [1, 1, 1]} : vector<1x9x9xf32> to vector<1x8x8xf32>
    %104 = vector.broadcast %102 : f32 to vector<1x8x8xf32>
    %105 = arith.mulf %104, %103 : vector<1x8x8xf32>
    %106 = arith.addf %99, %105 : vector<1x8x8xf32>
    %c0_48 = arith.constant 0 : index
    %c0_49 = arith.constant 0 : index
    %c0_50 = arith.constant 0 : index
    %c2_51 = arith.constant 2 : index
    %c0_52 = arith.constant 0 : index
    %c0_53 = arith.constant 0 : index
    %107 = vector.load %arg1[%c0_48, %c0_49, %c0_50, %c2_51, %c0_52, %c0_53] : memref<1x2x2x3x9x9xf32, #tpu.memory_space<vmem>>, vector<1x1x1x1x9x9xf32>
    %108 = vector.shape_cast %107 : vector<1x1x1x1x9x9xf32> to vector<1x9x9xf32>
    %c18 = arith.constant 18 : index
    %109 = memref.load %arg2[%c18] : memref<27xf32, #tpu.memory_space<smem>>
    %110 = vector.extract_strided_slice %108 {offsets = [0, 0, 0], sizes = [1, 8, 8], strides = [1, 1, 1]} : vector<1x9x9xf32> to vector<1x8x8xf32>
    %111 = vector.broadcast %109 : f32 to vector<1x8x8xf32>
    %112 = arith.mulf %111, %110 : vector<1x8x8xf32>
    %113 = arith.addf %106, %112 : vector<1x8x8xf32>
    %c20 = arith.constant 20 : index
    %114 = memref.load %arg2[%c20] : memref<27xf32, #tpu.memory_space<smem>>
    %115 = vector.extract_strided_slice %108 {offsets = [0, 0, 1], sizes = [1, 8, 8], strides = [1, 1, 1]} : vector<1x9x9xf32> to vector<1x8x8xf32>
    %116 = vector.broadcast %114 : f32 to vector<1x8x8xf32>
    %117 = arith.mulf %116, %115 : vector<1x8x8xf32>
    %118 = arith.addf %113, %117 : vector<1x8x8xf32>
    %c24 = arith.constant 24 : index
    %119 = memref.load %arg2[%c24] : memref<27xf32, #tpu.memory_space<smem>>
    %120 = vector.extract_strided_slice %108 {offsets = [0, 1, 0], sizes = [1, 8, 8], strides = [1, 1, 1]} : vector<1x9x9xf32> to vector<1x8x8xf32>
    %121 = vector.broadcast %119 : f32 to vector<1x8x8xf32>
    %122 = arith.mulf %121, %120 : vector<1x8x8xf32>
    %123 = arith.addf %118, %122 : vector<1x8x8xf32>
    %c26 = arith.constant 26 : index
    %124 = memref.load %arg2[%c26] : memref<27xf32, #tpu.memory_space<smem>>
    %125 = vector.extract_strided_slice %108 {offsets = [0, 1, 1], sizes = [1, 8, 8], strides = [1, 1, 1]} : vector<1x9x9xf32> to vector<1x8x8xf32>
    %126 = vector.broadcast %124 : f32 to vector<1x8x8xf32>
    %127 = arith.mulf %126, %125 : vector<1x8x8xf32>
    %128 = arith.addf %123, %127 : vector<1x8x8xf32>
    %c0_54 = arith.constant 0 : index
    %c0_55 = arith.constant 0 : index
    %c1_56 = arith.constant 1 : index
    %c2_57 = arith.constant 2 : index
    %c0_58 = arith.constant 0 : index
    %c0_59 = arith.constant 0 : index
    %129 = vector.load %arg1[%c0_54, %c0_55, %c1_56, %c2_57, %c0_58, %c0_59] : memref<1x2x2x3x9x9xf32, #tpu.memory_space<vmem>>, vector<1x1x1x1x9x9xf32>
    %130 = vector.shape_cast %129 : vector<1x1x1x1x9x9xf32> to vector<1x9x9xf32>
    %c19 = arith.constant 19 : index
    %131 = memref.load %arg2[%c19] : memref<27xf32, #tpu.memory_space<smem>>
    %132 = vector.extract_strided_slice %130 {offsets = [0, 0, 0], sizes = [1, 8, 8], strides = [1, 1, 1]} : vector<1x9x9xf32> to vector<1x8x8xf32>
    %133 = vector.broadcast %131 : f32 to vector<1x8x8xf32>
    %134 = arith.mulf %133, %132 : vector<1x8x8xf32>
    %135 = arith.addf %128, %134 : vector<1x8x8xf32>
    %c25 = arith.constant 25 : index
    %136 = memref.load %arg2[%c25] : memref<27xf32, #tpu.memory_space<smem>>
    %137 = vector.extract_strided_slice %130 {offsets = [0, 1, 0], sizes = [1, 8, 8], strides = [1, 1, 1]} : vector<1x9x9xf32> to vector<1x8x8xf32>
    %138 = vector.broadcast %136 : f32 to vector<1x8x8xf32>
    %139 = arith.mulf %138, %137 : vector<1x8x8xf32>
    %140 = arith.addf %135, %139 : vector<1x8x8xf32>
    %c0_60 = arith.constant 0 : index
    %c1_61 = arith.constant 1 : index
    %c0_62 = arith.constant 0 : index
    %c2_63 = arith.constant 2 : index
    %c0_64 = arith.constant 0 : index
    %c0_65 = arith.constant 0 : index
    %141 = vector.load %arg1[%c0_60, %c1_61, %c0_62, %c2_63, %c0_64, %c0_65] : memref<1x2x2x3x9x9xf32, #tpu.memory_space<vmem>>, vector<1x1x1x1x9x9xf32>
    %142 = vector.shape_cast %141 : vector<1x1x1x1x9x9xf32> to vector<1x9x9xf32>
    %c21 = arith.constant 21 : index
    %143 = memref.load %arg2[%c21] : memref<27xf32, #tpu.memory_space<smem>>
    %144 = vector.extract_strided_slice %142 {offsets = [0, 0, 0], sizes = [1, 8, 8], strides = [1, 1, 1]} : vector<1x9x9xf32> to vector<1x8x8xf32>
    %145 = vector.broadcast %143 : f32 to vector<1x8x8xf32>
    %146 = arith.mulf %145, %144 : vector<1x8x8xf32>
    %147 = arith.addf %140, %146 : vector<1x8x8xf32>
    %c23 = arith.constant 23 : index
    %148 = memref.load %arg2[%c23] : memref<27xf32, #tpu.memory_space<smem>>
    %149 = vector.extract_strided_slice %142 {offsets = [0, 0, 1], sizes = [1, 8, 8], strides = [1, 1, 1]} : vector<1x9x9xf32> to vector<1x8x8xf32>
    %150 = vector.broadcast %148 : f32 to vector<1x8x8xf32>
    %151 = arith.mulf %150, %149 : vector<1x8x8xf32>
    %152 = arith.addf %147, %151 : vector<1x8x8xf32>
    %c0_66 = arith.constant 0 : index
    %c1_67 = arith.constant 1 : index
    %c1_68 = arith.constant 1 : index
    %c2_69 = arith.constant 2 : index
    %c0_70 = arith.constant 0 : index
    %c0_71 = arith.constant 0 : index
    %153 = vector.load %arg1[%c0_66, %c1_67, %c1_68, %c2_69, %c0_70, %c0_71] : memref<1x2x2x3x9x9xf32, #tpu.memory_space<vmem>>, vector<1x1x1x1x9x9xf32>
    %154 = vector.shape_cast %153 : vector<1x1x1x1x9x9xf32> to vector<1x9x9xf32>
    %c22 = arith.constant 22 : index
    %155 = memref.load %arg2[%c22] : memref<27xf32, #tpu.memory_space<smem>>
    %156 = vector.extract_strided_slice %154 {offsets = [0, 0, 0], sizes = [1, 8, 8], strides = [1, 1, 1]} : vector<1x9x9xf32> to vector<1x8x8xf32>
    %157 = vector.broadcast %155 : f32 to vector<1x8x8xf32>
    %158 = arith.mulf %157, %156 : vector<1x8x8xf32>
    %159 = arith.addf %152, %158 : vector<1x8x8xf32>
    %c0_72 = arith.constant 0 : index
    %160 = memref.load %arg3[%c0_72] : memref<1xf32, #tpu.memory_space<smem>>
    %161 = vector.broadcast %160 : f32 to vector<1x8x8xf32>
    %162 = arith.addf %159, %161 : vector<1x8x8xf32>
    %cst_73 = arith.constant 3.000000e+00 : f32
    %163 = vector.broadcast %cst_73 : f32 to vector<1x8x8xf32>
    %164 = arith.addf %162, %163 : vector<1x8x8xf32>
    %cst_74 = arith.constant 0.000000e+00 : f32
    %cst_75 = arith.constant 6.000000e+00 : f32
    %165 = vector.broadcast %cst_74 : f32 to vector<1x8x8xf32>
    %166 = arith.maximumf %165, %164 : vector<1x8x8xf32>
    %167 = vector.broadcast %cst_75 : f32 to vector<1x8x8xf32>
    %168 = arith.minimumf %167, %166 : vector<1x8x8xf32>
    %169 = arith.mulf %162, %168 : vector<1x8x8xf32>
    %cst_76 = arith.constant 0.166666672 : f32
    %170 = vector.broadcast %cst_76 : f32 to vector<1x8x8xf32>
    %171 = arith.mulf %169, %170 : vector<1x8x8xf32>
    %c0_77 = arith.constant 0 : index
    %c0_78 = arith.constant 0 : index
    %c0_79 = arith.constant 0 : index
    %172 = vector.load %arg4[%c0_77, %c0_78, %c0_79] : memref<1x8x8xf32, #tpu.memory_space<vmem>>, vector<1x8x8xf32>
    tpu.vector_store %arg4[%c0_77, %c0_78, %c0_79], %171 {strides = array<i32>} : memref<1x8x8xf32, #tpu.memory_space<vmem>>, vector<1x8x8xf32>,
    return
  }
  func.func @transform_0(%arg0: i32) -> (i32, i32, i32, i32, i32, i32) {
    %c0_i32 = arith.constant 0 : i32
    %c0_i32_0 = arith.constant 0 : i32
    %c0_i32_1 = arith.constant 0 : i32
    %c0_i32_2 = arith.constant 0 : i32
    %c0_i32_3 = arith.constant 0 : i32
    %c0_i32_4 = arith.constant 0 : i32
    return %arg0, %c0_i32, %c0_i32_0, %c0_i32_1, %c0_i32_2, %c0_i32_3 : i32, i32, i32, i32, i32, i32
  }
  func.func @transform_1(%arg0: i32) -> i32 {
    %c0_i32 = arith.constant 0 : i32
    %c0_i32_0 = arith.constant 0 : i32
    return %c0_i32 : i32
  }
  func.func @transform_2(%arg0: i32) -> i32 {
    %c0_i32 = arith.constant 0 : i32
    %c0_i32_0 = arith.constant 0 : i32
    return %c0_i32 : i32
  }
  func.func @transform_3(%arg0: i32) -> (i32, i32, i32) {
    %c0_i32 = arith.constant 0 : i32
    %c0_i32_0 = arith.constant 0 : i32
    %c0_i32_1 = arith.constant 0 : i32
    return %arg0, %c0_i32, %c0_i32_0 : i32, i32, i32
  }
}

</mosaic_0001>

<bundles_post_ra>
// kernel: tpu_custom_call.1
= control target key start
LH: loop header
LB: loop body
LE: loop exit
PB: predicated region body
PF: predicated region fallthrough
CT: control target
= control target key end

     0   :  { %s959_s0 = inlined_call_operand.vmem [shape: f32[2,2,2,3,9,9], index: 0, kind: input, shape index: {}]   ;;  %s960_s1 = inlined_call_operand.vmem [shape: f32[27], index: 1, kind: input, shape index: {}]   ;;  %s961_s2 = inlined_call_operand.<no memory space> [shape: f32[1], index: 2, kind: input, shape index: {}]   ;;  %s962_s3 = inlined_call_operand.hbm [shape: f32[2,8,8], index: 3, kind: output, shape index: {}]  }
   0x1   :  { %8 = sst [smem:[#allocation2]] %s961_s2 }
   0x2   :  { %9 = vsyncpa [#allocation5], 0 }
   0x3   :  { %10 = vsyncpa [#allocation4], 0 }
   0x4   :  { %12 = vsyncpa [#allocation4 + $0x1], 0  ;;  %s725_s14 = smov 0   ;;  %s727_s15 = smov 0  }
   0x5   :  { %s729_s16 = smov 0   ;;  %s731_s17 = smov 0  }
   0x6 LB: > { %s746_s2 = sadd.s32 4294967295, %s697_s17   ;;  %s510_s18 = sadd.s32 4294967294, %s697_s17   ;;  %s697_s17 = sphi %s731_s17, %s969_s17   ;;  %s693_s16 = sphi %s729_s16, %s968_s16   ;;  %s689_s15 = sphi %s727_s15, %s967_s15   ;;  %s685_s14 = sphi %s725_s14, %s966_s14  }
   0x7   : > { %s750_s19 = sadd.s32 1, %s697_s17   ;;  %s93_s20 = sadd.s32 1, %s693_s16 }
   0x8   : > { %s90_s21 = ssub.s32 %s697_s17, %s750_s19  ;;  %p103_p0 = scmp.ne.s32.totalorder %s693_s16, %s689_s15 }
   0x9   : > { %p91_p1 = scmp.eq.s32.totalorder %s90_s21, 0  ;;  %p104_p2 = scmp.eq.s32.totalorder %s746_s2, 1 }
   0xa   : > { %p109_p3 = scmp.ne.s32.totalorder %s689_s15, %s685_s14  ;;  %p110_p4 = scmp.eq.s32.totalorder %s510_s18, 1 }
   0xb   : > { %s761_s22 = scalar_select %p91_p1, %s693_s16, %s93_s20  }
   0xc   : > { %p763_p5 = por %p104_p2, %p103_p0  ;;  %p767_p6 = por %p110_p4, %p109_p3 }
   0xd   : > { %p511_p7 = scmp.ge.s32.totalorder %s697_s17, 1  ;;  %p117_p8 = scmp.lt.s32.totalorder %s697_s17, 3 }
   0xe   : > { %p579_p9 = scmp.eq.s32.totalorder %s746_s2, 0  ;;  %s130_s28 = sshll.u32 %s960_s1, 4  ;;  %s131_s28 = int_to_ptr.vmem [resolvable:$true] %s130_s28 }
   0xf   : > { %p774_p10 = pnand %p511_p7, %p117_p8  ;;  %s616_s29 = scalar_lea.vmem %s131_s28, 16 }
  0x10   : > { %p617_p13 = scmp.ne.s32.totalorder %s131_s28, %s616_s29  ;;  %p624_p3 = scmp.lt.s32.totalorder %s131_s28, %s131_s28 }
  0x11   : > { %p571_p11 = pneg %p774_p10  ;;  %p625_p4 = scmp.lt.s32.totalorder %s616_s29, %s616_s29 }
  0x13   : > { %p572_p12 = pnand %p579_p9, %p571_p11  ;;  %p626_p7 = por %p625_p4, %p624_p3 }
  0x15   : > { %p618_p0 = pneg %p572_p12 }
  0x17   : > { %p619_p1 = pnand %p618_p0, %p617_p13 }
  0x19   : > { %p620_p2 = pneg %p619_p1 }
  0x1b   : > { %p627_p8 = pnand %p626_p7, %p620_p2 }
  0x1d   : > { %630 = shalt.err (!%p627_p8)
}
  0x1e   : > { %s699_s30 = smov [#allocation3]   ;;  %154 = sbr.rel (%p774_p10) target bundleno = 243 (0xf3), region = 32 }
  0x1f   : > { %574 = dma.vmem_to_smem (!%p572_p12), %s131_s28, 16, %s699_s30, [#allocation5]  }
  0x25   : > { %676 = dma.done.wait (%p579_p9), [#allocation5], 16  }
  0x26   : > { %678 = vsyncadd (%p579_p9), [#allocation5], 4294967280 }
  0x27   : > { %160 = sfence }
  0x28   : > { %p179_p11 = scmp.lt.s32.totalorder %s746_s2, 1  ;;  %s518_s4 = sld [smem:[#allocation3 + $0x2]]  ;;  %vm204_vm0 = vcmask 1046528   ;;  %vm423_vm1 = vcmask 64512  }
  0x29   : > { %s520_s5 = sld [smem:[#allocation3 + $0x8]]  ;;  %s527_s7 = sld [smem:[#allocation3 + $0x5]] }
  0x2a   : > { %s180_s6 = scalar_select %p179_p11, %s746_s2, 1 }
  0x2b   : > { %s793_s9 = sld [smem:[#allocation3 + $0xb]]  ;;  %s795_s10 = sld [smem:[#allocation3 + $0x11]] }
  0x2c   : > { %s564_s8 = smul.u32 192, %s180_s6  ;;  %s797_s11 = sld [smem:[#allocation3 + $0xe]] }
  0x2d   : > { %s804_s20 = sld [smem:[#allocation3 + $0x14]]  ;;  %s813_s21 = sld [smem:[#allocation3 + $0x1a]] }
  0x2e   : > { %s802_s18 = scalar_lea.vmem %s959_s0, %s564_s8  ;;  %v191_v0 = vstv %s518_s4  ;;  %s700_s25 = smov 127  }
  0x2f   : > { %v807_v1 = vld [vmem:[%s802_s18] sm:$0xff]  ;;  %v185_v2 = vld [vmem:[%s802_s18 + $0x8] sm:$0x1]  ;;  %v211_v3 = vstv %s520_s5  ;;  %v248_v8 = vstv %s527_s7  ;;  %s823_s26 = sld [smem:[#allocation3 + $0x6]]  ;;  %s830_s27 = sld [smem:[#allocation3 + $0x17]] }
  0x30   : > { %v811_v4 = vld [vmem:[%s802_s18 + $0x60] sm:$0xff]  ;;  %v192_v5 = vmul.f32 %v191_v0, %v807_v1  ;;  %v212_v6 = vmul.f32 %v211_v3, %v807_v1  ;;  %v213_v7 = vmul.f32 %v211_v3, %v185_v2  ;;  %v818_v9 = vld [vmem:[%s802_s18 + $0x10] sm:$0xff]  ;;  %v531_v10 = vld [vmem:[%s802_s18 + $0x18] sm:$0x1]  ;;  %s832_s28 = sld [smem:[#allocation3 + $0x7]]  ;;  %s852_s30 = sld [smem:[#allocation3 + $0x10]] }
  0x31   : > { %v249_v13 = vmul.f32 %v811_v4, %v248_v8  ;;  %v269_v14 = vstv %s793_s9  ;;  %v288_v15 = vstv %s795_s10  ;;  %v828_v16 = vld [vmem:[%s802_s18 + $0x20] sm:$0xff]  ;;  %v546_v21 = vld [vmem:[%s802_s18 + $0x28] sm:$0x1]  ;;  %s844_s29 = sld [smem:[#allocation3 + $0xf]]  ;;  %s549_s4 = sld [smem:[#allocation3 + $0x18]] }
  0x32   : > { %194 = vrot.lane.b32.xlu0 %v192_v5, %s700_s25  ;;  %v216_v11 = vrot.slane %v212_v6, 1  ;;  %v217_v12 = vrot.slane %v213_v7, 1  ;;  %v270_v18 = vmul.f32 %v818_v9, %v269_v14  ;;  %v289_v19 = vmul.f32 %v818_v9, %v288_v15  ;;  %v840_v22 = vld [vmem:[%s802_s18 + $0x70] sm:$0xff]  ;;  %v522_v33 = vld [vmem:[%s802_s18 + $0x38] sm:$0x1]  ;;  %v865_v42 = vld [vmem:[%s802_s18 + $0x80] sm:$0xff] }
  0x33   : > { %251 = vrot.lane.b32.xlu1 %v249_v13, %s700_s25  ;;  %v290_v20 = vmul.f32 %v531_v10, %v288_v15  ;;  %v325_v23 = vstv %s797_s11  ;;  %v365_v24 = vstv %s813_s21  ;;  %v346_v28 = vstv %s804_s20  ;;  %s554_s5 = sld [smem:[#allocation3 + $0x19]]  ;;  %s186_s6 = sld [smem:[#allocation3]] }
  0x34   : > { %v218_v17 = vsel %vm204_vm0, %v216_v11, %v217_v12  ;;  %v293_v25 = vrot.slane %v289_v19, 1  ;;  %v366_v27 = vmul.f32 %v828_v16, %v365_v24  ;;  %v367_v29 = vmul.f32 %v546_v21, %v365_v24  ;;  %v850_v30 = vld [vmem:[%s802_s18 + $0x30] sm:$0xff]  ;;  %v872_v51 = vld [vmem:[%s802_s18 + $0x40] sm:$0xff]  ;;  %v537_v52 = vld [vmem:[%s802_s18 + $0x48] sm:$0x1]  ;;  %s523_s7 = sld [smem:[#allocation3 + $0x1]] }
  0x35   : > { %v294_v26 = vrot.slane %v290_v20, 1  ;;  %v326_v32 = vmul.f32 %v840_v22, %v325_v23  ;;  %v199_v36 = vstv %s823_s26  ;;  %v347_v38 = vmul.f32 %v828_v16, %v346_v28  ;;  %v888_v11 = vld [vmem:[%s802_s18 + $0x50] sm:$0xff]  ;;  %v552_v12 = vld [vmem:[%s802_s18 + $0x58] sm:$0x1]  ;;  %s526_s8 = sld [smem:[#allocation3 + $0x3]]  ;;  %s529_s9 = sld [smem:[#allocation3 + $0x4]] }
  0x36   : > { %219 = vrot.lane.b32.xlu0 %v218_v17, %s700_s25  ;;  %v370_v34 = vrot.slane %v366_v27, 1  ;;  %v371_v35 = vrot.slane %v367_v29, 1  ;;  %v231_v37 = vstv %s832_s28  ;;  %v200_v39 = vmul.f32 %v199_v36, %v807_v1  ;;  %s532_s10 = sld [smem:[#allocation3 + $0x9]]  ;;  %s538_s11 = sld [smem:[#allocation3 + $0xa]] }
  0x37   : > { %272 = vrot.lane.b32.xlu1 %v270_v18, %s700_s25  ;;  %v295_v31 = vsel %vm204_vm0, %v293_v25, %v294_v26  ;;  %v201_v40 = vmul.f32 %v199_v36, %v185_v2  ;;  %v232_v41 = vmul.f32 %v850_v30, %v231_v37  ;;  %v402_v43 = vstv %s830_s27  ;;  %s541_s12 = sld [smem:[#allocation3 + $0xc]]  ;;  %s544_s13 = sld [smem:[#allocation3 + $0xd]] }
  0x38   : > { %v233_v44 = vmul.f32 %v522_v33, %v231_v37  ;;  %v205_v45 = vrot.slane %v200_v39, 1  ;;  %v372_v48 = vsel %vm204_vm0, %v370_v34, %v371_v35  ;;  %v277_v50 = vstv %s844_s29  ;;  %v528_v35 = vld [vmem:[%s802_s18 + $0x90] sm:$0xff]  ;;  %s547_s20 = sld [smem:[#allocation3 + $0x12]]  ;;  %s553_s21 = sld [smem:[#allocation3 + $0x13]] }
  0x39   : > { %v206_v46 = vrot.slane %v201_v40, 1  ;;  %v236_v47 = vrot.slane %v232_v41, 1  ;;  %v403_v53 = vmul.f32 %v865_v42, %v402_v43  ;;  %v278_v55 = vmul.f32 %v818_v9, %v277_v50  ;;  %s559_s26 = sld [smem:[#allocation3 + $0x16]]  ;;  %s415_s27 = sld [smem:[#allocation2]] }
  0x3a   : > { %296 = vrot.lane.b32.xlu0 %v295_v31, %s700_s25  ;;  %v237_v49 = vrot.slane %v233_v44, 1  ;;  %v279_v56 = vmul.f32 %v531_v10, %v277_v50  ;;  %v308_v58 = vstv %s852_s30  ;;  %v354_v5 = vstv %s549_s4  ;;  %s176_s28 = sand.u32 1, %s689_s15   ;;  %s561_s30 = sshll.u32 %s746_s2, 7 }
  0x3b   : > { %328 = vrot.lane.b32.xlu1 %v326_v32, %s700_s25  ;;  %v207_v54 = vsel %vm204_vm0, %v205_v45, %v206_v46  ;;  %v282_v59 = vrot.slane %v278_v55, 1  ;;  %v309_v61 = vmul.f32 %v872_v51, %v308_v58  ;;  %v310_v62 = vmul.f32 %v537_v52, %v308_v58  ;;  %v543_v55 = vld [vmem:[%s802_s18 + $0xa0] sm:$0xff]  ;;  %s516_s29 = sshll.u32 %s176_s28, 3  ;;  %s701_s2 = smov [#allocation6]  }
  0x3c   : > { %v238_v57 = vsel %vm204_vm0, %v236_v47, %v237_v49  ;;  %v283_v60 = vrot.slane %v279_v56, 1  ;;  %v355_v6 = vmul.f32 %v828_v16, %v354_v5  ;;  %v356_v7 = vmul.f32 %v546_v21, %v354_v5  ;;  %s178_s4 = scalar_lea.vmem [#allocation6], %s516_s29 }
  0x3d   : > { %v313_v0 = vrot.slane %v309_v61, 1  ;;  %v314_v2 = vrot.slane %v310_v62, 1  ;;  %v385_v14 = vstv %s554_s5  ;;  %v187_v21 = vstv %s186_s6  ;;  %s439_s5 = sshll.u32 %s178_s4, 4  ;;  %s919_s5 = int_to_ptr.vmem [resolvable:$true] %s439_s5 }
  0x3e   : > { %349 = vrot.lane.b32.xlu0 %v347_v38, %s700_s25  ;;  %v284_v63 = vsel %vm204_vm0, %v282_v59, %v283_v60  ;;  %v359_v8 = vrot.slane %v355_v6, 1  ;;  %v360_v10 = vrot.slane %v356_v7, 1  ;;  %v386_v15 = vmul.f32 %v888_v11, %v385_v14 }
  0x3f   : > { %373 = vrot.lane.b32.xlu1 %v372_v48, %s700_s25  ;;  %v315_v3 = vsel %vm204_vm0, %v313_v0, %v314_v2  ;;  %v387_v17 = vmul.f32 %v552_v12, %v385_v14  ;;  %v188_v23 = vmul.f32 %v187_v21, %v807_v1  ;;  %v227_v25 = vstv %s523_s7  ;;  %v558_v12 = vld [vmem:[%s802_s18 + $0xb0] sm:$0xff]  ;;  %s917_s7 = scalar_lea.hbm %s962_s3, %s561_s30 }
  0x40   : > { %v892_v13 = vsel %vm204_vm0, %v359_v8, %v360_v10  ;;  %v390_v18 = vrot.slane %v386_v15, 1  ;;  %v228_v27 = vmul.f32 %v850_v30, %v227_v25  ;;  %v244_v29 = vstv %s526_s8  ;;  %s426_s8 = scalar_lea.sflag [#allocation4], %s176_s28 }
  0x41   : > { %v391_v19 = vrot.slane %v387_v17, 1  ;;  %v245_v33 = vmul.f32 %v811_v4, %v244_v29  ;;  %v258_v36 = vstv %s529_s9  ;;  %v265_v39 = vstv %s532_s10  ;;  %s631_s9 = scalar_lea.vmem %s919_s5, 128  ;;  %s635_s10 = sshll.u32 %s701_s2, 4  ;;  %s636_s10 = int_to_ptr.vmem [resolvable:$false] %s635_s10 }
  0x42   : > { %405 = vrot.lane.b32.xlu0 %v403_v53, %s700_s25  ;;  %v259_v1 = vmul.f32 %v528_v35, %v258_v36  ;;  %v266_v43 = vmul.f32 %v818_v9, %v265_v39  ;;  %v304_v46 = vstv %s538_s11  ;;  %v321_v50 = vstv %s541_s12  ;;  %s556_s25 = sld [smem:[#allocation3 + $0x15]]  ;;  %p632_p9 = scmp.ne.s32.totalorder %s919_s5, %s631_s9 }
  0x43   : > { %v896_v20 = vsel %vm204_vm0, %v390_v18, %v391_v19  ;;  %v305_v48 = vmul.f32 %v872_v51, %v304_v46  ;;  %v335_v9 = vstv %s544_s13  ;;  %v342_v58 = vstv %s547_s20  ;;  %s637_s11 = scalar_lea.vmem %s636_s10, 256  ;;  %p638_p13 = scmp.lt.s32.totalorder %s919_s5, %s636_s10 }
  0x44   : > { %v336_v59 = vmul.f32 %v543_v55, %v335_v9  ;;  %v343_v62 = vmul.f32 %v828_v16, %v342_v58  ;;  %v381_v2 = vstv %s553_s21  ;;  %v412_v14 = vstv %s559_s26  ;;  %p633_p10 = pnand %p632_p9, %p763_p5  ;;  %p639_p0 = scmp.lt.s32.totalorder %s637_s11, %s631_s9 }
  0x45   : > { %v382_v6 = vmul.f32 %v888_v11, %v381_v2  ;;  %v413_v18 = vmul.f32 %v558_v12, %v412_v14 }
  0x46   : > { %p634_p12 = pneg %p633_p10  ;;  %p640_p1 = por %p639_p0, %p638_p13 }
  0x48   : > { %v398_v7 = vstv %s556_s25  ;;  %p641_p2 = pnand %p640_p1, %p634_p12 }
  0x49   : > { %v399_v16 = vmul.f32 %v865_v42, %v398_v7 }
  0xa4   : > { %v195_v24 = vpop.permute.xlu0 %194 }
  0xa5   : > { %v197_v26 = vadd.f32 %v195_v24, %v188_v23  ;;  %v252_v38 = vpop.permute.xlu1 %251  ;;  %v416_v23 = vstv %s415_s27 }
  0xa7   : > { %v209_v28 = vadd.f32 %v207_v54, %v197_v26  ;;  %v322_v54 = vmul.f32 %v840_v22, %v321_v50 }
  0xa8   : > { %v220_v31 = vpop.permute.xlu0 %219 }
  0xa9   : > { %v222_v32 = vadd.f32 %v220_v31, %v209_v28  ;;  %v273_v44 = vpop.permute.xlu1 %272 }
  0xab   : > { %v229_v34 = vadd.f32 %v228_v27, %v222_v32 }
  0xac   : > { %v297_v47 = vpop.permute.xlu0 %296 }
  0xad   : > { %v240_v37 = vadd.f32 %v238_v57, %v229_v34  ;;  %v329_v57 = vpop.permute.xlu1 %328 }
  0xaf   : > { %v246_v40 = vadd.f32 %v245_v33, %v240_v37 }
  0xb1   : > { %v254_v41 = vadd.f32 %v252_v38, %v246_v40  ;;  %v374_v22 = vpop.permute.xlu1 %373 }
  0xb3   : > { %v260_v30 = vadd.f32 %v259_v1, %v254_v41 }
  0xb5   : > { %v267_v45 = vadd.f32 %v266_v43, %v260_v30 }
  0xb7   : > { %v275_v4 = vadd.f32 %v273_v44, %v267_v45 }
  0xb9   : > { %v286_v49 = vadd.f32 %v284_v63, %v275_v4  ;;  %v350_v63 = vpop.permute.xlu0 %349 }
  0xbb   : > { %v299_v52 = vadd.f32 %v297_v47, %v286_v49 }
  0xbd   : > { %v306_v53 = vadd.f32 %v305_v48, %v299_v52  ;;  %v406_v17 = vpop.permute.xlu0 %405 }
  0xbf   : > { %v317_v56 = vadd.f32 %v315_v3, %v306_v53 }
  0xc1   : > { %v323_v60 = vadd.f32 %v322_v54, %v317_v56 }
  0xc3   : > { %v331_v61 = vadd.f32 %v329_v57, %v323_v60 }
  0xc5   : > { %v337_v51 = vadd.f32 %v336_v59, %v331_v61 }
  0xc7   : > { %v344_v0 = vadd.f32 %v343_v62, %v337_v51 }
  0xc9   : > { %v352_v5 = vadd.f32 %v350_v63, %v344_v0 }
  0xcb   : > { %v363_v3 = vadd.f32 %v892_v13, %v352_v5 }
  0xcd   : > { %v376_v8 = vadd.f32 %v374_v22, %v363_v3 }
  0xcf   : > { %v383_v10 = vadd.f32 %v382_v6, %v376_v8 }
  0xd1   : > { %v394_v15 = vadd.f32 %v896_v20, %v383_v10 }
  0xd3   : > { %v400_v19 = vadd.f32 %v399_v16, %v394_v15 }
  0xd5   : > { %v408_v21 = vadd.f32 %v406_v17, %v400_v19 }
  0xd7   : > { %v414_v11 = vadd.f32 %v413_v18, %v408_v21 }
  0xd9   : > { %v417_v24 = vadd.f32 %v416_v23, %v414_v11 }
  0xdb   : > { %v418_v13 = vadd.f32 3.0, %v417_v24 }
  0xdd   : > { %v419_v25 = vmax.f32 %v418_v13, 0.0 }
  0xdf   : > { %v420_v26 = vmin.f32 %v419_v25, 6.0 }
  0xe1   : > { %v421_v42 = vmul.f32 %v420_v26, %v417_v24 }
  0xe3   : > { %v422_v27 = vmul.f32 0.16666667, %v421_v42 }
  0xe5   : > { %424 = vst.msk [vmem:[%s178_s4] sm:$0xff] %vm423_vm1, %v422_v27 }
  0xe6   : > { %644 = shalt.err (!%p641_p2)
}
  0xe7   : > { %s645_s12 = scalar_lea.hbm %s917_s7, 128  ;;  %s649_s21 = scalar_lea.hbm %s962_s3, 256 }
  0xe8   : > { %p646_p3 = scmp.ne.s32.totalorder %s917_s7, %s645_s12  ;;  %p650_p8 = scmp.lt.u32.totalorder %s917_s7, %s962_s3 }
  0xe9   : > { %p651_p11 = scmp.lt.u32.totalorder %s649_s21, %s645_s12  ;;  %p653_p10 = scmp.lt.u32.totalorder %s645_s12, %s917_s7 }
  0xea   : > { %p647_p4 = pnand %p646_p3, %p763_p5 }
  0xeb   : > { %p652_p9 = por %p651_p11, %p650_p8 }
  0xec   : > { %p648_p7 = pneg %p647_p4 }
  0xed   : > { %p654_p12 = por %p653_p10, %p652_p9 }
  0xef   : > { %p655_p13 = pnand %p654_p12, %p648_p7 }
  0xf1   : > { %658 = shalt.err (!%p655_p13)
}
  0xf2   : > { %569 = dma.vmem_to_hbm [thread:$0]  (%p763_p5), %s919_s5, 128, %s917_s7, %s426_s8  }
  0xf3 PF: > { %p581_p0 = scmp.ge.s32.totalorder %s697_s17, 2  ;;  %s451_s27 = sand.u32 1, %s685_s14  }
  0xf4   : > { %s452_s28 = scalar_lea.sflag [#allocation4], %s451_s27 }
  0xf5   : > { %p576_p1 = pnand %p581_p0, %p767_p6 }
  0xf7   : > { %680 = dma.done.wait (!%p576_p1), %s452_s28, 128  }
  0xf8   : > { %682 = vsyncadd (!%p576_p1), %s452_s28, 4294967168  ;;  %p15_p2 = scmp.ge.s32.totalorder %s750_s19, 4   ;;  %s966_s14 = smov %s689_s15 }
  0xf9   : > { %s967_s15 = smov %s693_s16  ;;  %s968_s16 = smov %s761_s22 }
  0xfa   : > { %s969_s17 = smov %s750_s19  ;;  %17 = sbr.rel (!%p15_p2) target bundleno = 6 (0x6), region = 83 }
 0x101   :  { %457 = vsyncpa [#allocation4], 1 }
 0x102   :  { %459 = vsyncpa [#allocation4 + $0x1], 1 }
 0x103   :  { %460 = vsyncpa [#allocation5], 1 }
 0x104   :  { %462 = vsyncpa [#allocation5 + $0x1], 1 }

</bundles_post_ra>
